<compile_context>
chip_gen: v7x
topology: tpu7x:2x2x1
jax: 0.10.0
libtpu: 0.0.40
codegen_flags: <defaults>
</compile_context>

<pallas_src>
import jax
import jax.numpy as jnp
from jax import lax
from jax.experimental import pallas as pl
from jax.experimental.pallas import tpu as pltpu


def _cdiv(a, b):
    return -(-a // b)


def _make_kernel(B_true, tb, T, R, S, sixth):
    def kernel(tri_ref, alpha_ref, mask_ref, sp_ref, rg_ref):
        c = pl.program_id(0)   # core-parallel axis
        j = pl.program_id(1)   # batch-tile reduction axis

        @pl.when(j == 0)
        def _init():
            sp_ref[...] = jnp.zeros_like(sp_ref)
            rg_ref[...] = jnp.zeros_like(rg_ref)

        tri = tri_ref[...]                                   # (tb, R, F) native dtype

        def sl(k):
            # 256-wide, lane-aligned slice cast to f32 (bounded f32 temporary).
            return tri[..., k * sixth:(k + 1) * sixth].astype(jnp.float32)

        h_re, h_im = sl(0), sl(1)
        r_re, r_im = sl(2), sl(3)
        t_re, t_im = sl(4), sl(5)

        # Per-(b, r) lane reductions of the *unscaled* triple features.
        s0 = jnp.sum(r_re * (h_re * t_re + h_im * t_im)
                     + r_im * (h_re * t_im - h_im * t_re), axis=-1)      # (tb, R)
        q = jnp.sum(h_re * h_re + h_im * h_im + r_re * r_re + r_im * r_im
                    + t_re * t_re + t_im * t_im, axis=-1)                # (tb, R)

        al = alpha_ref[...].astype(jnp.float32)              # (tb, R, S)  S on lanes
        mk = mask_ref[...].astype(jnp.float32)               # (tb, 1, S)

        a = (al - jnp.float32(0.1)) * mk                     # (tb, R, S)
        a2 = a * a
        score = (a2 * a) * (-s0)[:, :, None]                 # (tb, R, S)

        # Numerically stable softplus: max(x,0) + log1p(exp(-|x|)).
        softp = jnp.maximum(score, 0.0) + jnp.log1p(jnp.exp(-jnp.abs(score)))

        # Mask padded batch rows (softplus(0) = ln 2 is NOT free).
        row0 = (c * T + j) * tb
        rows = row0 + lax.broadcasted_iota(jnp.int32, (tb, 1, 1), 0)
        softp = jnp.where(rows < B_true, softp, 0.0)

        # Vector-shaped accumulation into the resident output blocks; the
        # cross-lane/sublane reduce is deferred to the XLA epilogue.
        sp_ref[...] += jnp.sum(softp, axis=0, keepdims=True)             # (1, R, S)
        rg_ref[...] += jnp.sum(a2 * q[:, :, None], axis=0, keepdims=True)

    return kernel


def knowledge_criterion(tri_feat_org, alpha, mask, *,
                        batch_tile=None, vmem_limit_bytes=None):
    """tri_feat_org: (B,R,F), alpha: (B,S,R), mask: (B,S) -> scalar float32."""
    B, R, F = tri_feat_org.shape
    Bm, S = mask.shape
    assert Bm == B and alpha.shape == (B, S, R)
    assert F % 6 == 0, "feature dim must split into 6 equal slices (spec: 1536)"
    sixth = F // 6

    # --- generation-aware VMEM budget -------------------------------------
    try:
        vmem_cap = int(pltpu.get_tpu_info().vmem_capacity_bytes)
    except Exception:
        vmem_cap = 64 * 1024 * 1024          # conservative (v7x per-TC VMEM)
    if vmem_limit_bytes is None:
        vmem_limit_bytes = max(32 * 1024 * 1024,
                               min((vmem_cap * 3) // 4, 96 * 1024 * 1024))

    # Live VMEM per batch row: double-buffered inputs + in-kernel f32 temps.
    t_i = tri_feat_org.dtype.itemsize
    a_i = alpha.dtype.itemsize
    m_i = mask.dtype.itemsize
    bytes_per_row = ((R * F) * (2 * t_i + 3 * 4)
                     + (S * R) * (2 * a_i + 4 * 4)
                     + S * (2 * m_i + 4))
    if batch_tile is None:
        budget = vmem_cap // 3               # leave headroom for compiler scratch
        batch_tile = int(max(1, min(B, budget // max(bytes_per_row, 1))))
    tb = int(batch_tile)

    # --- grid: (core-parallel, batch-tile reduction) -----------------------
    num_tiles = _cdiv(B, tb)
    NC = 2 if num_tiles >= 2 else 1          # shard across v7x's two TCs
    num_tiles = _cdiv(num_tiles, NC) * NC
    T = num_tiles // NC
    tb = _cdiv(B, num_tiles)                 # re-balance -> minimal padding
    B_pad = num_tiles * tb

    # Lane-dense layouts: seq axis on the 128 lanes for the a/softplus stage.
    alpha_t = jnp.transpose(alpha, (0, 2, 1))        # (B, R, S)
    mask3 = mask.reshape(B, 1, S)                    # (B, 1, S)

    if B_pad > B:
        pad = B_pad - B
        tri_p = jnp.pad(tri_feat_org, ((0, pad), (0, 0), (0, 0)))
        alpha_p = jnp.pad(alpha_t, ((0, pad), (0, 0), (0, 0)))
        mask_p = jnp.pad(mask3, ((0, pad), (0, 0), (0, 0)))
    else:
        tri_p, alpha_p, mask_p = tri_feat_org, alpha_t, mask3

    kernel = _make_kernel(B, tb, T, R, S, sixth)

    sp_part, rg_part = pl.pallas_call(
        kernel,
        out_shape=(jax.ShapeDtypeStruct((NC, R, S), jnp.float32),
                   jax.ShapeDtypeStruct((NC, R, S), jnp.float32)),
        grid_spec=pltpu.PrefetchScalarGridSpec(
            num_scalar_prefetch=0,
            grid=(NC, T),
            in_specs=[
                pl.BlockSpec((tb, R, F), lambda c, j: (c * T + j, 0, 0)),
                pl.BlockSpec((tb, R, S), lambda c, j: (c * T + j, 0, 0)),
                pl.BlockSpec((tb, 1, S), lambda c, j: (c * T + j, 0, 0)),
            ],
            out_specs=[
                pl.BlockSpec((1, R, S), lambda c, j: (c, 0, 0)),
                pl.BlockSpec((1, R, S), lambda c, j: (c, 0, 0)),
            ],
        ),
        compiler_params=pltpu.CompilerParams(
            dimension_semantics=("parallel", "arbitrary"),
            vmem_limit_bytes=int(vmem_limit_bytes),
        ),
    )(tri_p, alpha_p, mask_p)

    # XLA epilogue: final cross-lane reduce, numtrue and the scalar combine.
    numtrue = jnp.sum(mask.astype(jnp.float32))
    sp_total = jnp.sum(sp_part)
    rg_total = jnp.sum(rg_part)
    regul = rg_total / jnp.float32(B * S * R * sixth)
    return sp_total / numtrue + jnp.float32(0.01) * regul


def knowledge_criterion_ref(tri_feat_org, alpha, mask):
    """Pure-JAX reference mirroring the PyTorch forward literally."""
    numtrue = jnp.sum(mask)
    a = (alpha - 0.1) * mask[:, :, None]                       # (B,S,R)
    x = tri_feat_org[:, None, :, :] * a[..., None]             # (B,S,R,F)
    h = x[..., :512]
    r = x[..., 512:1024]
    t = x[..., 1024:]
    h_re, h_im = h[..., :256], h[..., 256:]
    r_re, r_im = r[..., :256], r[..., 256:]
    t_re, t_im = t[..., :256], t[..., 256:]
    score = -jnp.sum(h_re * t_re * r_re + h_im * t_im * r_re
                     + h_re * t_im * r_im - h_im * t_re * r_im, axis=-1)
    regul = (jnp.mean(h_re ** 2) + jnp.mean(h_im ** 2) + jnp.mean(t_re ** 2)
             + jnp.mean(t_im ** 2) + jnp.mean(r_re ** 2) + jnp.mean(r_im ** 2))
    softplus = lambda v: jnp.logaddexp(v, 0.0)
    return jnp.sum(softplus(score)) / numtrue + 0.01 * regul


if __name__ == "__main__":
    key = jax.random.PRNGKey(0)
    k1, k2 = jax.random.split(key, 2)

    B, S, R, F = 2, 8, 4, 1536   # F=1536 is hard-coded by the module's slicing
    tri = jax.random.normal(k1, (B, R, F), dtype=jnp.float32)
    alpha = jax.random.normal(k2, (B, S, R), dtype=jnp.float32)
    lengths = jnp.array([5, 8], dtype=jnp.int32)
    mask = (jnp.arange(S)[None, :] < lengths[:, None]).astype(jnp.float32)

    out = knowledge_criterion(tri, alpha, mask)
    out = jax.block_until_ready(out)

    ref = knowledge_criterion_ref(tri, alpha, mask)
    assert jnp.allclose(out, ref, rtol=1e-4, atol=1e-4), (out, ref)

    print("KERNEL_OK")
</pallas_src>

<mosaic_0001>
module attributes {stable_mosaic.version = 11 : i64} {
  func.func @kernel(%arg0: i32, %arg1: i32, %arg2: memref<2x4x1536xf32, #tpu.memory_space<vmem>>, %arg3: memref<2x4x8xf32, #tpu.memory_space<vmem>>, %arg4: memref<2x1x8xf32, #tpu.memory_space<vmem>>, %arg5: memref<1x4x8xf32, #tpu.memory_space<vmem>>, %arg6: memref<1x4x8xf32, #tpu.memory_space<vmem>>) attributes {dimension_semantics = [#tpu.dimension_semantics<parallel>, #tpu.dimension_semantics<arbitrary>], iteration_bounds = array<i64: 1, 1>, scalar_prefetch = 0 : i64, scratch_operands = 0 : i64, tpu.core_type = #tpu.core_type<tc>, window_params = [{transform_indices = @transform_0, window_bounds = array<i64: 2, 4, 1536>}, {transform_indices = @transform_1, window_bounds = array<i64: 2, 4, 8>}, {transform_indices = @transform_2, window_bounds = array<i64: 2, 1, 8>}, {transform_indices = @transform_3, window_bounds = array<i64: 1, 4, 8>}, {transform_indices = @transform_4, window_bounds = array<i64: 1, 4, 8>}]} {
    %c0_i32 = arith.constant 0 : i32
    %0 = arith.cmpi eq, %arg1, %c0_i32 : i32
    %1 = arith.extui %0 : i1 to i32
    %c0_i32_0 = arith.constant 0 : i32
    %2 = arith.cmpi ne, %1, %c0_i32_0 : i32
    scf.if %2 {
      %cst_30 = arith.constant 0.000000e+00 : f32
      %78 = vector.broadcast %cst_30 : f32 to vector<1x4x8xf32>
      %c0_31 = arith.constant 0 : index
      %c0_32 = arith.constant 0 : index
      %c0_33 = arith.constant 0 : index
      %79 = vector.load %arg5[%c0_31, %c0_32, %c0_33] : memref<1x4x8xf32, #tpu.memory_space<vmem>>, vector<1x4x8xf32>
      tpu.vector_store %arg5[%c0_31, %c0_32, %c0_33], %78 {strides = array<i32>} : memref<1x4x8xf32, #tpu.memory_space<vmem>>, vector<1x4x8xf32>,
      %cst_34 = arith.constant 0.000000e+00 : f32
      %80 = vector.broadcast %cst_34 : f32 to vector<1x4x8xf32>
      %c0_35 = arith.constant 0 : index
      %c0_36 = arith.constant 0 : index
      %c0_37 = arith.constant 0 : index
      %81 = vector.load %arg6[%c0_35, %c0_36, %c0_37] : memref<1x4x8xf32, #tpu.memory_space<vmem>>, vector<1x4x8xf32>
      tpu.vector_store %arg6[%c0_35, %c0_36, %c0_37], %80 {strides = array<i32>} : memref<1x4x8xf32, #tpu.memory_space<vmem>>, vector<1x4x8xf32>,
    } else {
    }
    %c0 = arith.constant 0 : index
    %c0_1 = arith.constant 0 : index
    %c0_2 = arith.constant 0 : index
    %3 = vector.load %arg2[%c0, %c0_1, %c0_2] : memref<2x4x1536xf32, #tpu.memory_space<vmem>>, vector<2x4x1536xf32>
    %4 = vector.extract_strided_slice %3 {offsets = [0, 0, 0], sizes = [2, 4, 256], strides = [1, 1, 1]} : vector<2x4x1536xf32> to vector<2x4x256xf32>
    %5 = vector.extract_strided_slice %3 {offsets = [0, 0, 256], sizes = [2, 4, 256], strides = [1, 1, 1]} : vector<2x4x1536xf32> to vector<2x4x256xf32>
    %6 = vector.extract_strided_slice %3 {offsets = [0, 0, 512], sizes = [2, 4, 256], strides = [1, 1, 1]} : vector<2x4x1536xf32> to vector<2x4x256xf32>
    %7 = vector.extract_strided_slice %3 {offsets = [0, 0, 768], sizes = [2, 4, 256], strides = [1, 1, 1]} : vector<2x4x1536xf32> to vector<2x4x256xf32>
    %8 = vector.extract_strided_slice %3 {offsets = [0, 0, 1024], sizes = [2, 4, 256], strides = [1, 1, 1]} : vector<2x4x1536xf32> to vector<2x4x256xf32>
    %9 = vector.extract_strided_slice %3 {offsets = [0, 0, 1280], sizes = [2, 4, 256], strides = [1, 1, 1]} : vector<2x4x1536xf32> to vector<2x4x256xf32>
    %10 = arith.mulf %4, %8 : vector<2x4x256xf32>
    %11 = arith.mulf %5, %9 : vector<2x4x256xf32>
    %12 = arith.addf %10, %11 : vector<2x4x256xf32>
    %13 = arith.mulf %6, %12 : vector<2x4x256xf32>
    %14 = arith.mulf %4, %9 : vector<2x4x256xf32>
    %15 = arith.mulf %5, %8 : vector<2x4x256xf32>
    %16 = arith.subf %14, %15 : vector<2x4x256xf32>
    %17 = arith.mulf %7, %16 : vector<2x4x256xf32>
    %18 = arith.addf %13, %17 : vector<2x4x256xf32>
    %cst = arith.constant dense<0.000000e+00> : vector<2x4xf32>
    %19 = vector.multi_reduction <add>, %18, %cst [2] : vector<2x4x256xf32> to vector<2x4xf32>
    %20 = arith.mulf %4, %4 : vector<2x4x256xf32>
    %21 = arith.mulf %5, %5 : vector<2x4x256xf32>
    %22 = arith.addf %20, %21 : vector<2x4x256xf32>
    %23 = arith.mulf %6, %6 : vector<2x4x256xf32>
    %24 = arith.addf %22, %23 : vector<2x4x256xf32>
    %25 = arith.mulf %7, %7 : vector<2x4x256xf32>
    %26 = arith.addf %24, %25 : vector<2x4x256xf32>
    %27 = arith.mulf %8, %8 : vector<2x4x256xf32>
    %28 = arith.addf %26, %27 : vector<2x4x256xf32>
    %29 = arith.mulf %9, %9 : vector<2x4x256xf32>
    %30 = arith.addf %28, %29 : vector<2x4x256xf32>
    %cst_3 = arith.constant dense<0.000000e+00> : vector<2x4xf32>
    %31 = vector.multi_reduction <add>, %30, %cst_3 [2] : vector<2x4x256xf32> to vector<2x4xf32>
    %c0_4 = arith.constant 0 : index
    %c0_5 = arith.constant 0 : index
    %c0_6 = arith.constant 0 : index
    %32 = vector.load %arg3[%c0_4, %c0_5, %c0_6] : memref<2x4x8xf32, #tpu.memory_space<vmem>>, vector<2x4x8xf32>
    %c0_7 = arith.constant 0 : index
    %c0_8 = arith.constant 0 : index
    %c0_9 = arith.constant 0 : index
    %33 = vector.load %arg4[%c0_7, %c0_8, %c0_9] : memref<2x1x8xf32, #tpu.memory_space<vmem>>, vector<2x1x8xf32>
    %cst_10 = arith.constant 1.000000e-01 : f32
    %34 = vector.broadcast %cst_10 : f32 to vector<2x4x8xf32>
    %35 = arith.subf %32, %34 : vector<2x4x8xf32>
    %36 = vector.broadcast %33 : vector<2x1x8xf32> to vector<2x4x8xf32>
    %37 = arith.mulf %35, %36 : vector<2x4x8xf32>
    %38 = arith.mulf %37, %37 : vector<2x4x8xf32>
    %39 = arith.mulf %38, %37 : vector<2x4x8xf32>
    %cst_11 = arith.constant 0.000000e+00 : f32
    %40 = vector.broadcast %cst_11 : f32 to vector<2x4xf32>
    %41 = arith.subf %40, %19 : vector<2x4xf32>
    %42 = vector.shape_cast %41 : vector<2x4xf32> to vector<2x4x1xf32>
    %43 = vector.broadcast %42 : vector<2x4x1xf32> to vector<2x4x8xf32>
    %44 = arith.mulf %39, %43 : vector<2x4x8xf32>
    %cst_12 = arith.constant 0.000000e+00 : f32
    %45 = vector.broadcast %cst_12 : f32 to vector<2x4x8xf32>
    %46 = arith.maximumf %44, %45 : vector<2x4x8xf32>
    %47 = math.absf %44 : vector<2x4x8xf32>
    %cst_13 = arith.constant 0.000000e+00 : f32
    %48 = vector.broadcast %cst_13 : f32 to vector<2x4x8xf32>
    %49 = arith.subf %48, %47 : vector<2x4x8xf32>
    %50 = math.exp %49 : vector<2x4x8xf32>
    %51 = math.log1p %50 : vector<2x4x8xf32>
    %52 = arith.addf %46, %51 : vector<2x4x8xf32>
    %c1_i32 = arith.constant 1 : i32
    %53 = arith.muli %arg0, %c1_i32 : i32
    %54 = arith.addi %53, %arg1 : i32
    %c2_i32 = arith.constant 2 : i32
    %55 = arith.muli %54, %c2_i32 : i32
    %56 = tpu.iota {dimensions = array<i32: 0>} : vector<2x1x1xi32>
    %57 = vector.broadcast %55 : i32 to vector<2x1x1xi32>
    %58 = arith.addi %57, %56 : vector<2x1x1xi32>
    %c2_i32_14 = arith.constant 2 : i32
    %59 = vector.broadcast %c2_i32_14 : i32 to vector<2x1x1xi32>
    %60 = arith.cmpi slt, %58, %59 : vector<2x1x1xi32>
    %cst_15 = arith.constant 0.000000e+00 : f32
    %61 = vector.shape_cast %60 : vector<2x1x1xi1> to vector<2x1x1xi1>
    %62 = vector.broadcast %61 : vector<2x1x1xi1> to vector<2x4x8xi1>
    %63 = vector.broadcast %cst_15 : f32 to vector<2x4x8xf32>
    %64 = arith.select %62, %52, %63 : vector<2x4x8xi1>, vector<2x4x8xf32>
    %c0_16 = arith.constant 0 : index
    %c0_17 = arith.constant 0 : index
    %c0_18 = arith.constant 0 : index
    %65 = vector.load %arg5[%c0_16, %c0_17, %c0_18] : memref<1x4x8xf32, #tpu.memory_space<vmem>>, vector<1x4x8xf32>
    %cst_19 = arith.constant dense<0.000000e+00> : vector<4x8xf32>
    %66 = vector.multi_reduction <add>, %64, %cst_19 [0] : vector<2x4x8xf32> to vector<4x8xf32>
    %67 = vector.shape_cast %66 : vector<4x8xf32> to vector<1x4x8xf32>
    %68 = arith.addf %65, %67 : vector<1x4x8xf32>
    %c0_20 = arith.constant 0 : index
    %c0_21 = arith.constant 0 : index
    %c0_22 = arith.constant 0 : index
    %69 = vector.load %arg5[%c0_20, %c0_21, %c0_22] : memref<1x4x8xf32, #tpu.memory_space<vmem>>, vector<1x4x8xf32>
    tpu.vector_store %arg5[%c0_20, %c0_21, %c0_22], %68 {strides = array<i32>} : memref<1x4x8xf32, #tpu.memory_space<vmem>>, vector<1x4x8xf32>,
    %c0_23 = arith.constant 0 : index
    %c0_24 = arith.constant 0 : index
    %c0_25 = arith.constant 0 : index
    %70 = vector.load %arg6[%c0_23, %c0_24, %c0_25] : memref<1x4x8xf32, #tpu.memory_space<vmem>>, vector<1x4x8xf32>
    %71 = vector.shape_cast %31 : vector<2x4xf32> to vector<2x4x1xf32>
    %72 = vector.broadcast %71 : vector<2x4x1xf32> to vector<2x4x8xf32>
    %73 = arith.mulf %38, %72 : vector<2x4x8xf32>
    %cst_26 = arith.constant dense<0.000000e+00> : vector<4x8xf32>
    %74 = vector.multi_reduction <add>, %73, %cst_26 [0] : vector<2x4x8xf32> to vector<4x8xf32>
    %75 = vector.shape_cast %74 : vector<4x8xf32> to vector<1x4x8xf32>
    %76 = arith.addf %70, %75 : vector<1x4x8xf32>
    %c0_27 = arith.constant 0 : index
    %c0_28 = arith.constant 0 : index
    %c0_29 = arith.constant 0 : index
    %77 = vector.load %arg6[%c0_27, %c0_28, %c0_29] : memref<1x4x8xf32, #tpu.memory_space<vmem>>, vector<1x4x8xf32>
    tpu.vector_store %arg6[%c0_27, %c0_28, %c0_29], %76 {strides = array<i32>} : memref<1x4x8xf32, #tpu.memory_space<vmem>>, vector<1x4x8xf32>,
    return
  }
  func.func @transform_0(%arg0: i32, %arg1: i32) -> (i32, i32, i32) {
    %c1_i32 = arith.constant 1 : i32
    %0 = arith.muli %arg0, %c1_i32 : i32
    %1 = arith.addi %0, %arg1 : i32
    %c0_i32 = arith.constant 0 : i32
    %c0_i32_0 = arith.constant 0 : i32
    %c0_i32_1 = arith.constant 0 : i32
    return %1, %c0_i32, %c0_i32_0 : i32, i32, i32
  }
  func.func @transform_1(%arg0: i32, %arg1: i32) -> (i32, i32, i32) {
    %c1_i32 = arith.constant 1 : i32
    %0 = arith.muli %arg0, %c1_i32 : i32
    %1 = arith.addi %0, %arg1 : i32
    %c0_i32 = arith.constant 0 : i32
    %c0_i32_0 = arith.constant 0 : i32
    %c0_i32_1 = arith.constant 0 : i32
    return %1, %c0_i32, %c0_i32_0 : i32, i32, i32
  }
  func.func @transform_2(%arg0: i32, %arg1: i32) -> (i32, i32, i32) {
    %c1_i32 = arith.constant 1 : i32
    %0 = arith.muli %arg0, %c1_i32 : i32
    %1 = arith.addi %0, %arg1 : i32
    %c0_i32 = arith.constant 0 : i32
    %c0_i32_0 = arith.constant 0 : i32
    %c0_i32_1 = arith.constant 0 : i32
    return %1, %c0_i32, %c0_i32_0 : i32, i32, i32
  }
  func.func @transform_3(%arg0: i32, %arg1: i32) -> (i32, i32, i32) {
    %c0_i32 = arith.constant 0 : i32
    %c0_i32_0 = arith.constant 0 : i32
    %c0_i32_1 = arith.constant 0 : i32
    return %arg0, %c0_i32, %c0_i32_0 : i32, i32, i32
  }
  func.func @transform_4(%arg0: i32, %arg1: i32) -> (i32, i32, i32) {
    %c0_i32 = arith.constant 0 : i32
    %c0_i32_0 = arith.constant 0 : i32
    %c0_i32_1 = arith.constant 0 : i32
    return %arg0, %c0_i32, %c0_i32_0 : i32, i32, i32
  }
}

</mosaic_0001>

<bundles_post_ra>
// kernel: tpu_custom_call.1
= control target key start
LH: loop header
LB: loop body
LE: loop exit
PB: predicated region body
PF: predicated region fallthrough
CT: control target
= control target key end

     0   :  { %10 = vsyncpa [#allocation3], 0  ;;  %s509_s0 = inlined_call_operand.hbm [shape: f32[2,4,1536], index: 0, kind: input, shape index: {}]   ;;  %s510_s1 = inlined_call_operand.hbm [shape: f32[2,4,8], index: 1, kind: input, shape index: {}]   ;;  %s511_s2 = inlined_call_operand.vmem [shape: f32[2,1,8], index: 2, kind: input, shape index: {}]   ;;  %s512_s3 = inlined_call_operand.hbm [shape: f32[1,4,8], index: 3, kind: output, shape index: {0}]   ;;  %s513_s4 = inlined_call_operand.hbm [shape: f32[1,4,8], index: 4, kind: output, shape index: {1}]  }
   0x1   :  { %11 = vsyncpa [#allocation6], 0 }
   0x2   :  { %12 = vsyncpa [#allocation4], 0 }
   0x3   :  { %13 = vsyncpa [#allocation9], 0  ;;  %s405_s15 = smov [#allocation2]   ;;  %s309_s19 = scalar_lea.hbm %s509_s0, 1536 }
   0x4   :  { %s24_s16 = sshll.u32 %s405_s15, 4  ;;  %p310_p0 = scmp.ne.s32.totalorder %s509_s0, %s309_s19  ;;  %s25_s16 = int_to_ptr.vmem [resolvable:$true] %s24_s16 }
   0x5   :  { %p313_p1 = scmp.lt.u32.totalorder %s309_s19, %s509_s0 }
   0x7   :  { %p315_p2 = pnand %p313_p1, %p310_p0 }
   0x9   :  { %318 = shalt.err (!%p315_p2)
}
   0xa   :  { %s319_s24 = scalar_lea.vmem %s25_s16, 1536  ;;  %p324_p4 = scmp.lt.s32.totalorder %s25_s16, %s25_s16 }
   0xb   :  { %p320_p3 = scmp.ne.s32.totalorder %s25_s16, %s319_s24  ;;  %p325_p5 = scmp.lt.s32.totalorder %s319_s24, %s319_s24 }
   0xd   :  { %p326_p6 = por %p325_p5, %p324_p4 }
   0xf   :  { %p327_p7 = pnand %p326_p6, %p320_p3 }
  0x11   :  { %330 = shalt.err (!%p327_p7)
}
  0x12   :  { %s406_s25 = smov 768   ;;  %s407_s26 = smov 48  }
  0x13   :  { %30 = dma.hbm_to_vmem [thread:$0]  %s509_s0, 1536, %s25_s16, [#allocation3], %s406_s25, %s406_s25, %s407_s26  }
  0x14   :  { %s408_s29 = smov [#allocation5]   ;;  %s331_s7 = scalar_lea.hbm %s510_s1, 128 }
  0x15   :  { %s40_s30 = sshll.u32 %s408_s29, 4  ;;  %p332_p8 = scmp.ne.s32.totalorder %s510_s1, %s331_s7  ;;  %s41_s30 = int_to_ptr.vmem [resolvable:$true] %s40_s30 }
  0x16   :  { %p335_p9 = scmp.lt.u32.totalorder %s331_s7, %s510_s1 }
  0x18   :  { %p337_p10 = pnand %p335_p9, %p332_p8 }
  0x1a   :  { %340 = shalt.err (!%p337_p10)
}
  0x1b   :  { %s341_s12 = scalar_lea.vmem %s41_s30, 128  ;;  %p346_p12 = scmp.lt.s32.totalorder %s41_s30, %s41_s30 }
  0x1c   :  { %p342_p11 = scmp.ne.s32.totalorder %s41_s30, %s341_s12  ;;  %p347_p13 = scmp.lt.s32.totalorder %s341_s12, %s341_s12 }
  0x1e   :  { %p348_p0 = por %p347_p13, %p346_p12 }
  0x20   :  { %p349_p1 = pnand %p348_p0, %p342_p11 }
  0x22   :  { %352 = shalt.err (!%p349_p1)
}
  0x23   :  { %s409_s0 = smov 64   ;;  %s410_s13 = smov 4  }
  0x24   :  { %46 = dma.hbm_to_vmem [thread:$0]  %s510_s1, 128, %s41_s30, [#allocation6], %s409_s0, %s409_s0, %s410_s13  }
  0x25   :  { %397 = dma.done.wait [#allocation3], 1536  }
  0x26   :  { %398 = vsyncadd [#allocation3], 4294965760 }
  0x27   :  { %399 = dma.done.wait [#allocation6], 128  }
  0x28   :  { %400 = vsyncadd [#allocation6], 4294967168  ;;  %v85_v0 = vld [vmem:[#allocation2] sm:$0xff]  ;;  %v86_v1 = vld [vmem:[#allocation2 + $0x8] sm:$0xff]  ;;  %vm121_vm0 = vcmask 1043456   ;;  %vm82_vm1 = vcmask 60416  }
  0x29   :  { %v87_v2 = vld [vmem:[#allocation2 + $0x10] sm:$0xff]  ;;  %v88_v3 = vld [vmem:[#allocation2 + $0x18] sm:$0xff]  ;;  %v89_v4 = vld [vmem:[#allocation2 + $0x20] sm:$0xff]  ;;  %v132_v7 = vmul.f32 %v85_v0, %v85_v0  ;;  %v134_v8 = vmul.f32 %v86_v1, %v86_v1 }
  0x2a   :  { %v90_v5 = vld [vmem:[#allocation2 + $0x28] sm:$0xff]  ;;  %v138_v6 = vmul.f32 %v87_v2, %v87_v2  ;;  %v97_v9 = vmul.f32 %v89_v4, %v85_v0  ;;  %v107_v12 = vmul.f32 %v89_v4, %v86_v1  ;;  %v91_v13 = vld [vmem:[#allocation2 + $0x30] sm:$0xff]  ;;  %v92_v14 = vld [vmem:[#allocation2 + $0x38] sm:$0xff]  ;;  %v142_v16 = vmul.f32 %v88_v3, %v88_v3 }
  0x2b   :  { %v99_v10 = vmul.f32 %v90_v5, %v86_v1  ;;  %v105_v11 = vmul.f32 %v90_v5, %v85_v0  ;;  %v93_v15 = vld [vmem:[#allocation2 + $0x40] sm:$0xff]  ;;  %v95_v17 = vld [vmem:[#allocation2 + $0x50] sm:$0xff]  ;;  %v96_v18 = vld [vmem:[#allocation2 + $0x58] sm:$0xff]  ;;  %v136_v20 = vadd.f32 %v134_v8, %v132_v7  ;;  %v146_v28 = vmul.f32 %v89_v4, %v89_v4 }
  0x2c   :  { %v139_v19 = vmul.f32 %v93_v15, %v93_v15  ;;  %v98_v23 = vmul.f32 %v95_v17, %v91_v13  ;;  %v100_v24 = vmul.f32 %v96_v18, %v92_v14  ;;  %v106_v25 = vmul.f32 %v96_v18, %v91_v13  ;;  %v94_v31 = vld [vmem:[#allocation2 + $0x48] sm:$0xff]  ;;  %v290_v7 = vld [vmem:[%s511_s2] ss:$0 sm:$0xff]  ;;  %v171_v8 = vld [vmem:[#allocation5 + $0x4] sm:$0xf] }
  0x2d   :  { %v101_v21 = vadd.f32 %v99_v10, %v97_v9  ;;  %v109_v22 = vsub.f32 %v105_v11, %v107_v12  ;;  %v108_v26 = vmul.f32 %v95_v17, %v92_v14  ;;  %v140_v27 = vadd.f32 %v138_v6, %v136_v20  ;;  %v291_v11 = vld [vmem:[%s511_s2 + $0x1] ss:$0 sm:$0xff]  ;;  %s412_s2 = smov [#allocation8]  }
  0x2e   :  { %v102_v32 = vadd.f32 %v100_v24, %v98_v23  ;;  %v150_v33 = vmul.f32 %v90_v5, %v90_v5  ;;  %v133_v36 = vmul.f32 %v91_v13, %v91_v13  ;;  %v135_v37 = vmul.f32 %v92_v14, %v92_v14  ;;  %v170_v5 = vld [vmem:[#allocation5] sm:$0xf]  ;;  %s271_s19 = sshll.u32 %s412_s2, 4  ;;  %s272_s19 = int_to_ptr.vmem [resolvable:$true] %s271_s19 }
  0x2f   :  { %v103_v29 = vmul.f32 %v101_v21, %v87_v2  ;;  %v111_v30 = vmul.f32 %v109_v22, %v88_v3  ;;  %v110_v34 = vsub.f32 %v106_v25, %v108_v26  ;;  %v144_v35 = vadd.f32 %v142_v16, %v140_v27  ;;  %s353_s20 = scalar_lea.vmem %s272_s19, 64  ;;  %p358_p3 = scmp.lt.s32.totalorder %s272_s19, %s272_s19 }
  0x30   :  { %v104_v39 = vmul.f32 %v102_v32, %v93_v15  ;;  %v137_v42 = vadd.f32 %v135_v37, %v133_v36  ;;  %v143_v45 = vmul.f32 %v94_v31, %v94_v31  ;;  %v147_v50 = vmul.f32 %v95_v17, %v95_v17  ;;  %p354_p2 = scmp.ne.s32.totalorder %s272_s19, %s353_s20  ;;  %p359_p4 = scmp.lt.s32.totalorder %s353_s20, %s353_s20 }
  0x31   :  { %v113_v38 = vadd.f32 %v111_v30, %v103_v29  ;;  %v112_v40 = vmul.f32 %v110_v34, %v94_v31  ;;  %v148_v41 = vadd.f32 %v146_v28, %v144_v35  ;;  %v151_v57 = vmul.f32 %v96_v18, %v96_v18 }
  0x32   :  { %v141_v48 = vadd.f32 %v139_v19, %v137_v42  ;;  %v411_v4 = vmov 0.0   ;;  %v288_v6 = vadd.f32 -0.1, %v170_v5  ;;  %v289_v10 = vadd.f32 -0.1, %v171_v8  ;;  %p360_p5 = por %p359_p4, %p358_p3 }
  0x33   :  { %v117_v43 = vcombine.high %v113_v38, %v113_v38  ;;  %v122_v44 = vsel %vm121_vm0, %v113_v38, 0.0  ;;  %v114_v46 = vadd.f32 %v112_v40, %v104_v39  ;;  %v152_v47 = vadd.f32 %v150_v33, %v148_v41  ;;  %84 = vst.msk [vmem:[#allocation8] sm:$0xf] %vm82_vm1, %v411_v4  ;;  %83 = vst.msk [vmem:[#allocation7] sm:$0xf] %vm82_vm1, %v411_v4 }
  0x34   :  { %v145_v56 = vadd.f32 %v143_v45, %v141_v48  ;;  %v188_v9 = vmul.f32 %v290_v7, %v288_v6  ;;  %v189_v13 = vmul.f32 %v291_v11, %v289_v10  ;;  %p361_p6 = pnand %p360_p5, %p354_p2 }
  0x35   :  { %v123_v49 = vsel %vm121_vm0, %v117_v43, 0.0  ;;  %v118_v52 = vcombine.high %v114_v46, %v114_v46  ;;  %v127_v53 = vsel %vm121_vm0, %v114_v46, 0.0  ;;  %v156_v54 = vcombine.high %v152_v47, %v152_v47 }
  0x36   :  { %v124_v51 = vadd.f32 %v123_v49, %v122_v44  ;;  %v160_v55 = vsel %vm121_vm0, %v152_v47, 0.0  ;;  %v149_v62 = vadd.f32 %v147_v50, %v145_v56  ;;  %v190_v12 = vmul.f32 %v188_v9, %v188_v9 }
  0x37   :  { %v128_v58 = vsel %vm121_vm0, %v118_v52, 0.0  ;;  %v161_v59 = vsel %vm121_vm0, %v156_v54, 0.0  ;;  %v191_v15 = vmul.f32 %v189_v13, %v189_v13 }
  0x38   :  { %125 = vadd.xlane.f32.xlu0 %v124_v51  ;;  %v129_v60 = vadd.f32 %v128_v58, %v127_v53  ;;  %v162_v61 = vadd.f32 %v161_v59, %v160_v55  ;;  %v153_v63 = vadd.f32 %v151_v57, %v149_v62  ;;  %v192_v14 = vmul.f32 %v190_v12, %v188_v9 }
  0x39   :  { %v193_v19 = vmul.f32 %v191_v15, %v189_v13 }
  0x3a   :  { %163 = vadd.xlane.f32.xlu1 %v162_v61  ;;  %v157_v0 = vcombine.high %v153_v63, %v153_v63  ;;  %v165_v1 = vsel %vm121_vm0, %v153_v63, 0.0  ;;  %v247_v34 = vld [vmem:[#allocation8] sm:$0xf] }
  0x3c   :  { %130 = vadd.xlane.f32.xlu0 %v129_v60  ;;  %v166_v2 = vsel %vm121_vm0, %v157_v0, 0.0 }
  0x3d   :  { %v167_v3 = vadd.f32 %v166_v2, %v165_v1 }
  0x3f   :  { %168 = vadd.xlane.f32.xlu1 %v167_v3 }
  0xc5   :  { %v126_v16 = vpop.xlane.xlu0 %125 }
  0xc6   :  { %v194_v17 = vsub.f32 0.0, %v126_v16 }
  0xc7   :  { %v164_v21 = vpop.xlane.xlu1 %163 }
  0xc8   :  { %v196_v18 = vmul.f32 %v194_v17, %v192_v14  ;;  %v248_v26 = vmul.f32 %v190_v12, %v164_v21 }
  0xc9   :  { %v131_v20 = vpop.xlane.xlu0 %130 }
  0xca   :  { %v200_v22 = vand.u32 2147483647, %v196_v18  ;;  %v195_v23 = vsub.f32 0.0, %v131_v20  ;;  %v250_v31 = vsel %vm82_vm1, %v248_v26, 0.0 }
  0xcc   :  { %v202_v24 = vsub.f32 0.0, %v200_v22  ;;  %v197_v25 = vmul.f32 %v195_v23, %v193_v19  ;;  %v169_v29 = vpop.xlane.xlu1 %168 }
  0xcd   :  { %v249_v32 = vmul.f32 %v191_v15, %v169_v29 }
  0xce   :  { %v204_v27 = vmul.f32 1.442695, %v202_v24  ;;  %v201_v28 = vand.u32 2147483647, %v197_v25 }
  0xcf   :  { %v251_v35 = vsel %vm82_vm1, %v249_v32, 0.0 }
  0xd0   :  { %301 = vpow2.f32 %v204_v27  ;;  %v203_v30 = vsub.f32 0.0, %v201_v28  ;;  %v252_v36 = vadd.f32 %v251_v35, %v250_v31 }
  0xd2   :  { %v206_v33 = vmul.f32 1.442695, %v203_v30  ;;  %v253_v37 = vadd.f32 %v252_v36, %v247_v34 }
  0xd4   :  { %303 = vpow2.f32 %v206_v33  ;;  %254 = vst.msk [vmem:[#allocation8] sm:$0xf] %vm82_vm1, %v253_v37 }
  0xd5   :  { %364 = shalt.err (!%p361_p6)
}
  0xd6   :  { %s365_s23 = scalar_lea.hbm %s513_s4, 64 }
  0xd7   :  { %p366_p7 = scmp.ne.s32.totalorder %s513_s4, %s365_s23  ;;  %p369_p8 = scmp.lt.u32.totalorder %s365_s23, %s513_s4 }
  0xd9   :  { %p371_p9 = pnand %p369_p8, %p366_p7 }
  0xdb   :  { %374 = shalt.err (!%p371_p9)
}
  0xdc   :  { %274 = dma.vmem_to_hbm [thread:$0]  %s272_s19, 64, %s513_s4, [#allocation9]   ;;  %v302_v38 = vpop.eup %301  ;;  %v198_v53 = vmax.f32 %v196_v18, 0.0  ;;  %v199_v57 = vmax.f32 %v197_v25, 0.0  ;;  %v240_v62 = vld [vmem:[#allocation7] sm:$0xf] }
  0xdd   :  { %v208_v39 = vadd.f32 1.0, %v302_v38  ;;  %v211_v42 = vmul.f32 -0.5, %v302_v38  ;;  %v214_v45 = vand.u32 2147483647, %v302_v38  ;;  %s413_s4 = smov [#allocation7]  }
  0xde   :  { %v304_v40 = vpop.eup %303  ;;  %s261_s30 = sshll.u32 %s413_s4, 4  ;;  %s262_s30 = int_to_ptr.vmem [resolvable:$true] %s261_s30 }
  0xdf   :  { %305 = vlog2.f32 %v208_v39  ;;  %v217_v41 = vadd.f32 1.0, %v304_v40  ;;  %v212_v43 = vadd.f32 1.0, %v211_v42  ;;  %v220_v44 = vmul.f32 -0.5, %v304_v40  ;;  %s375_s5 = scalar_lea.vmem %s262_s30, 64  ;;  %p380_p11 = scmp.lt.s32.totalorder %s262_s30, %s262_s30 }
  0xe0   :  { %vm215_vm2 = vcmp.lt.f32.partialorder %v214_v45, 0.0004427343  ;;  %v223_v50 = vand.u32 2147483647, %v304_v40  ;;  %p376_p10 = scmp.ne.s32.totalorder %s262_s30, %s375_s5  ;;  %p381_p12 = scmp.lt.s32.totalorder %s375_s5, %s375_s5 }
  0xe1   :  { %307 = vlog2.f32 %v217_v41  ;;  %v213_v48 = vmul.f32 %v302_v38, %v212_v43  ;;  %v221_v49 = vadd.f32 1.0, %v220_v44 }
  0xe2   :  { %vm224_vm3 = vcmp.lt.f32.partialorder %v223_v50, 0.0004427343  ;;  %p382_p13 = por %p381_p12, %p380_p11 }
  0xe3   :  { %v222_v55 = vmul.f32 %v304_v40, %v221_v49 }
  0xe4   :  { %p383_p0 = pnand %p382_p13, %p376_p10 }
  0xe9   :  { %v306_v46 = vpop.eup %305 }
  0xea   :  { %v210_v47 = vmul.f32 0.6931472, %v306_v46 }
  0xeb   :  { %v308_v52 = vpop.eup %307 }
  0xec   :  { %v216_v51 = vsel %vm215_vm2, %v213_v48, %v210_v47  ;;  %v219_v54 = vmul.f32 0.6931472, %v308_v52 }
  0xed   :  { %v226_v56 = vadd.f32 %v216_v51, %v198_v53 }
  0xee   :  { %v225_v58 = vsel %vm224_vm3, %v222_v55, %v219_v54 }
  0xef   :  { %v227_v59 = vadd.f32 %v225_v58, %v199_v57  ;;  %v242_v60 = vsel %vm82_vm1, %v226_v56, 0.0 }
  0xf1   :  { %v243_v61 = vsel %vm82_vm1, %v227_v59, 0.0 }
  0xf2   :  { %v244_v63 = vadd.f32 %v243_v61, %v242_v60 }
  0xf4   :  { %v245_v0 = vadd.f32 %v244_v63, %v240_v62 }
  0xf6   :  { %246 = vst.msk [vmem:[#allocation7] sm:$0xf] %vm82_vm1, %v245_v0 }
  0xf7   :  { %386 = shalt.err (!%p383_p0)
}
  0xf8   :  { %s387_s8 = scalar_lea.hbm %s512_s3, 64 }
  0xf9   :  { %p388_p1 = scmp.ne.s32.totalorder %s512_s3, %s387_s8  ;;  %p391_p2 = scmp.lt.u32.totalorder %s387_s8, %s512_s3 }
  0xfb   :  { %p393_p3 = pnand %p391_p2, %p388_p1 }
  0xfd   :  { %396 = shalt.err (!%p393_p3)
}
  0xfe   :  { %264 = dma.vmem_to_hbm [thread:$0]  %s262_s30, 64, %s512_s3, [#allocation4]  }
  0xff   :  { %401 = dma.done.wait [#allocation4], 64  }
 0x100   :  { %402 = vsyncadd [#allocation4], 4294967232 }
 0x101   :  { %403 = dma.done.wait [#allocation9], 64  }
 0x102   :  { %404 = vsyncadd [#allocation9], 4294967232 }
 0x103   :  { %281 = vsyncpa [#allocation3], 1 }
 0x104   :  { %282 = vsyncpa [#allocation6], 1 }
 0x105   :  { %283 = vsyncpa [#allocation4], 1 }
 0x106   :  { %284 = vsyncpa [#allocation9], 1 }

</bundles_post_ra>
